<compile_context>
chip_gen: v5e
topology: v5e:2x2
jax: 0.10.0
libtpu: 0.0.40
codegen_flags: <defaults>
</compile_context>

<pallas_src>
import functools

import jax
import jax.numpy as jnp
from jax.experimental import pallas as pl
from jax.experimental.pallas import tpu as pltpu

SUBLANE = 8
LANE = 128  # bump to 256 for large, compute-bound layers on v6e/v7x


def _round_up(x: int, m: int) -> int:
    return (x + m - 1) // m * m


def chatbot_mlp_kernel(x_ref, w1_ref, b1_ref, w2_ref, b2_ref, o_ref):
    """One batch tile of: fc1 -> ReLU -> fc2.

    x_ref        : (TB, Ip)  float32   (cast to bf16 in-kernel, hidden under MXU)
    w1_ref       : (Ip, Hp)  bfloat16
    b1_ref       : (1,  Hp)  float32
    w2_ref       : (Hp, Op)  bfloat16
    b2_ref       : (1,  Op)  float32
    o_ref        : (TB, Op)  float32   (lane-dense, unmasked store)
    """
    x = x_ref[...].astype(jnp.bfloat16)
    # fc1 on the MXU, f32 accumulation; bias + ReLU epilogue in f32 on the VPU.
    h = jnp.dot(x, w1_ref[...], preferred_element_type=jnp.float32)
    h = jnp.maximum(h + b1_ref[...], 0.0)
    # fc2: re-feed the activation to the MXU in bf16, accumulate in f32.
    out = jnp.dot(h.astype(jnp.bfloat16), w2_ref[...],
                  preferred_element_type=jnp.float32)
    o_ref[...] = (out + b2_ref[...]).astype(o_ref.dtype)


def make_chatbot_forward(w1, b1, w2, b2, *, batch_tile=512):
    """Build a jitted forward(x) for the PyTorch ChatbotModel semantics.

    w1 : (input_size, hidden_size)   (transposed PyTorch fc1.weight)
    b1 : (hidden_size,) or (1, hidden_size)
    w2 : (hidden_size, output_size)  (transposed PyTorch fc2.weight)
    b2 : (output_size,) or (1, output_size)

    Parameters are padded to (8,128)-friendly shapes and cast to their kernel
    dtypes exactly once here; the returned forward() only pads/slices x.
    Zero padding keeps the math exact (zero w1 rows, relu(0)=0 hidden cols,
    zero w2 rows); padded outputs are sliced off.
    """
    in_size, hidden = w1.shape
    out_size = w2.shape[1]

    Ip = _round_up(in_size, LANE)
    Hp = _round_up(hidden, LANE)
    Op = _round_up(out_size, LANE)

    b1 = jnp.reshape(b1, (1, hidden)).astype(jnp.float32)
    b2 = jnp.reshape(b2, (1, out_size)).astype(jnp.float32)

    # One-time padding + dtype conversion (jit-time constants of forward()).
    w1_p = jnp.pad(w1, ((0, Ip - in_size), (0, Hp - hidden))).astype(jnp.bfloat16)
    b1_p = jnp.pad(b1, ((0, 0), (0, Hp - hidden)))
    w2_p = jnp.pad(w2, ((0, Hp - hidden), (0, Op - out_size))).astype(jnp.bfloat16)
    b2_p = jnp.pad(b2, ((0, 0), (0, Op - out_size)))

    vmem_spec = pl.BlockSpec(memory_space=pltpu.MemorySpace.VMEM)

    def _cost(rows):
        flops = 2 * rows * (Ip * Hp + Hp * Op)
        bytes_accessed = (rows * Ip * 4 + Ip * Hp * 2 + Hp * 4
                          + Hp * Op * 2 + Op * 4 + rows * Op * 4)
        return pl.CostEstimate(flops=flops, transcendentals=0,
                               bytes_accessed=bytes_accessed)

    def forward(x):
        B = x.shape[0]
        Bp = _round_up(B, SUBLANE)
        # x stays f32 here; the bf16 cast happens inside the kernel.
        x_p = jnp.pad(x.astype(jnp.float32),
                      ((0, Bp - B), (0, Ip - in_size)))

        if Bp <= batch_tile:
            # Gridless: every operand is one VMEM-resident block.
            out_p = pl.pallas_call(
                chatbot_mlp_kernel,
                out_shape=jax.ShapeDtypeStruct((Bp, Op), jnp.float32),
                in_specs=[vmem_spec] * 5,
                out_specs=vmem_spec,
                cost_estimate=_cost(Bp),
            )(x_p, w1_p, b1_p, w2_p, b2_p)
        else:
            # Large-batch path: tile the batch, shard the parallel axis across
            # TensorCores (v7x megacore); weights/biases use constant index
            # maps so they stay resident while x / out stream.
            Bt = _round_up(Bp, batch_tile)
            x_p = jnp.pad(x_p, ((0, Bt - Bp), (0, 0)))
            out_p = pl.pallas_call(
                chatbot_mlp_kernel,
                out_shape=jax.ShapeDtypeStruct((Bt, Op), jnp.float32),
                grid=(Bt // batch_tile,),
                in_specs=[
                    pl.BlockSpec((batch_tile, Ip), lambda i: (i, 0)),
                    pl.BlockSpec((Ip, Hp), lambda i: (0, 0)),
                    pl.BlockSpec((1, Hp), lambda i: (0, 0)),
                    pl.BlockSpec((Hp, Op), lambda i: (0, 0)),
                    pl.BlockSpec((1, Op), lambda i: (0, 0)),
                ],
                out_specs=pl.BlockSpec((batch_tile, Op), lambda i: (i, 0)),
                compiler_params=pltpu.CompilerParams(
                    dimension_semantics=("parallel",),
                    # Headroom for larger batch tiles; budgeted within v7x's
                    # 64 MiB physical VMEM (double-buffered x/out tiles).
                    vmem_limit_bytes=48 << 20,
                ),
                cost_estimate=_cost(Bt),
            )(x_p, w1_p, b1_p, w2_p, b2_p)

        return out_p[:B, :out_size]

    return jax.jit(forward)


if __name__ == "__main__":
    # Small deterministic shapes consistent with the module:
    #   input_size = TF-IDF vocab size (synthetic: 32)
    #   hidden_size = 64 (as in the source)
    #   output_size = number of answers (synthetic: 16)
    batch = 2
    input_size = 32
    hidden_size = 64
    output_size = 16

    key = jax.random.PRNGKey(0)
    kx, kw1, kb1, kw2, kb2, kx2 = jax.random.split(key, 6)

    # nn.Linear weights stored transposed: fc1.weight (hidden,input) -> (input,hidden).
    w1 = jax.random.normal(kw1, (input_size, hidden_size), dtype=jnp.float32) * 0.1
    b1 = jax.random.normal(kb1, (1, hidden_size), dtype=jnp.float32) * 0.1
    w2 = jax.random.normal(kw2, (hidden_size, output_size), dtype=jnp.float32) * 0.1
    b2 = jax.random.normal(kb2, (1, output_size), dtype=jnp.float32) * 0.1

    def ref_forward(x):
        return jnp.maximum(x @ w1 + b1, 0.0) @ w2 + b2

    # --- Path 1: small batch (gridless, single VMEM-resident block). ---
    forward = make_chatbot_forward(w1, b1, w2, b2)
    x = jax.random.normal(kx, (batch, input_size), dtype=jnp.float32)
    out = forward(x)
    jax.block_until_ready(out)
    ref = ref_forward(x)
    assert out.shape == (batch, output_size)
    # bf16 matmul operands + f32 accumulation => loose tolerance vs f32 ref.
    assert jnp.allclose(out, ref, atol=2e-2, rtol=2e-2), float(
        jnp.max(jnp.abs(out - ref)))

    # --- Path 2: batch-tiled grid (parallel batch axis), small tile to test. ---
    forward_tiled = make_chatbot_forward(w1, b1, w2, b2, batch_tile=8)
    x2 = jax.random.normal(kx2, (24, input_size), dtype=jnp.float32)
    out2 = forward_tiled(x2)
    jax.block_until_ready(out2)
    ref2 = ref_forward(x2)
    assert out2.shape == (24, output_size)
    assert jnp.allclose(out2, ref2, atol=2e-2, rtol=2e-2), float(
        jnp.max(jnp.abs(out2 - ref2)))

    print("KERNEL_OK")
</pallas_src>

<mosaic_0001>
module attributes {stable_mosaic.version = 11 : i64} {
  func.func @chatbot_mlp_kernel(%arg0: memref<8x128xf32, #tpu.memory_space<vmem>>, %arg1: memref<128x128xbf16, #tpu.memory_space<vmem>>, %arg2: memref<1x128xf32, #tpu.memory_space<vmem>>, %arg3: memref<128x128xbf16, #tpu.memory_space<vmem>>, %arg4: memref<1x128xf32, #tpu.memory_space<vmem>>, %arg5: memref<8x128xf32, #tpu.memory_space<vmem>>) attributes {dimension_semantics = [], scalar_prefetch = 0 : i64, scratch_operands = 0 : i64, tpu.core_type = #tpu.core_type<tc>} {
    %c0 = arith.constant 0 : index
    %c0_0 = arith.constant 0 : index
    %0 = vector.load %arg0[%c0, %c0_0] : memref<8x128xf32, #tpu.memory_space<vmem>>, vector<8x128xf32>
    %1 = arith.truncf %0 : vector<8x128xf32> to vector<8x128xbf16>
    %c0_1 = arith.constant 0 : index
    %c0_2 = arith.constant 0 : index
    %2 = vector.load %arg1[%c0_1, %c0_2] : memref<128x128xbf16, #tpu.memory_space<vmem>>, vector<128x128xbf16>
    %cst = arith.constant dense<0.000000e+00> : vector<8x128xf32>
    %3 = tpu.matmul %1, %2, %cst {dimension_numbers = #tpu.dot_dimension_numbers<[1], [0], [0], [1], [0, 0, 1, 1], [], []>} : vector<8x128xbf16>, vector<128x128xbf16>, vector<8x128xf32> -> vector<8x128xf32>
    %c0_3 = arith.constant 0 : index
    %c0_4 = arith.constant 0 : index
    %4 = vector.load %arg2[%c0_3, %c0_4] : memref<1x128xf32, #tpu.memory_space<vmem>>, vector<1x128xf32>
    %5 = vector.broadcast %4 : vector<1x128xf32> to vector<8x128xf32>
    %6 = arith.addf %3, %5 : vector<8x128xf32>
    %cst_5 = arith.constant 0.000000e+00 : f32
    %7 = vector.broadcast %cst_5 : f32 to vector<8x128xf32>
    %8 = arith.maximumf %6, %7 : vector<8x128xf32>
    %9 = arith.truncf %8 : vector<8x128xf32> to vector<8x128xbf16>
    %c0_6 = arith.constant 0 : index
    %c0_7 = arith.constant 0 : index
    %10 = vector.load %arg3[%c0_6, %c0_7] : memref<128x128xbf16, #tpu.memory_space<vmem>>, vector<128x128xbf16>
    %cst_8 = arith.constant dense<0.000000e+00> : vector<8x128xf32>
    %11 = tpu.matmul %9, %10, %cst_8 {dimension_numbers = #tpu.dot_dimension_numbers<[1], [0], [0], [1], [0, 0, 1, 1], [], []>} : vector<8x128xbf16>, vector<128x128xbf16>, vector<8x128xf32> -> vector<8x128xf32>
    %c0_9 = arith.constant 0 : index
    %c0_10 = arith.constant 0 : index
    %12 = vector.load %arg4[%c0_9, %c0_10] : memref<1x128xf32, #tpu.memory_space<vmem>>, vector<1x128xf32>
    %13 = vector.broadcast %12 : vector<1x128xf32> to vector<8x128xf32>
    %14 = arith.addf %11, %13 : vector<8x128xf32>
    %c0_11 = arith.constant 0 : index
    %c0_12 = arith.constant 0 : index
    %15 = vector.load %arg5[%c0_11, %c0_12] : memref<8x128xf32, #tpu.memory_space<vmem>>, vector<8x128xf32>
    tpu.vector_store %arg5[%c0_11, %c0_12], %14 {strides = array<i32>} : memref<8x128xf32, #tpu.memory_space<vmem>>, vector<8x128xf32>,
    return
  }
}

</mosaic_0001>

<bundles_post_ra>
// kernel: forward.1
= control target key start
LH: loop header
LB: loop body
LE: loop exit
PB: predicated region body
PF: predicated region fallthrough
CT: control target
= control target key end

     0   :  { %10 = vsyncpa [#allocation3], 0  ;;  %s415_s0 = inlined_call_operand.vmem [shape: f32[8,128], index: 0, kind: input, shape index: {}]   ;;  %s416_s1 = inlined_call_operand.hbm [shape: bf16[128,128], index: 1, kind: input, shape index: {}]   ;;  %s417_s2 = inlined_call_operand.vmem [shape: f32[1,128], index: 2, kind: input, shape index: {}]   ;;  %s418_s3 = inlined_call_operand.hbm [shape: bf16[128,128], index: 3, kind: input, shape index: {}]   ;;  %s419_s4 = inlined_call_operand.vmem [shape: f32[1,128], index: 4, kind: input, shape index: {}]   ;;  %s420_s5 = inlined_call_operand.vmem [shape: f32[8,128], index: 5, kind: output, shape index: {}]  }
   0x1   :  { %s18_s20 = sshll.u32 %s416_s1, 4  ;;  %s19_s20 = int_to_ptr.hbm [resolvable:$true] %s18_s20 }
   0x2   :  { %11 = vsyncpa [#allocation5], 0  ;;  %s363_s21 = smov [#allocation2]   ;;  %s33_s25 = sshll.u32 %s418_s3, 4  ;;  %s34_s25 = int_to_ptr.hbm [resolvable:$true] %s33_s25 }
   0x3   :  { %s20_s22 = sshll.u32 %s363_s21, 4  ;;  %s364_s26 = smov 64   ;;  %s21_s22 = int_to_ptr.vmem [resolvable:$true] %s20_s22 }
   0x4   :  { %s365_s27 = smov 4   ;;  %s366_s28 = smov [#allocation4]  }
   0x5   :  { %26 = dma.hbm_to_vmem [thread:$0]  %s19_s20, 1024, %s21_s22, [#allocation3], %s364_s26, %s364_s26, %s365_s27  }
   0x6   :  { %s35_s29 = sshll.u32 %s366_s28, 4  ;;  %s36_s29 = int_to_ptr.vmem [resolvable:$true] %s35_s29 }
   0x7   :  { %41 = dma.hbm_to_vmem [thread:$0]  %s34_s25, 1024, %s36_s29, [#allocation5], %s364_s26, %s364_s26, %s365_s27  }
   0x8   :  { %359 = dma.done.wait [#allocation3], 1024  }
   0x9   :  { %360 = vsyncadd [#allocation3], 4294966272 }
   0xa   :  { %361 = dma.done.wait [#allocation5], 1024  }
   0xb   :  { %362 = vsyncadd [#allocation5], 4294966272  ;;  %v296_v0 = vld [vmem:[#allocation2 + $0x38] sm:$0xff]  ;;  %v295_v1 = vld [vmem:[#allocation2 + $0x30] sm:$0xff] }
   0xc   :  { %122 = vmatpush.bf16.msra.mxu0 %v296_v0  ;;  %v304_v2 = vld [vmem:[#allocation4 + $0x38] sm:$0xff]  ;;  %v303_v3 = vld [vmem:[#allocation4 + $0x30] sm:$0xff]  ;;  %v294_v4 = vld [vmem:[#allocation2 + $0x28] sm:$0xff] }
   0xd   :  { %205 = vmatpush.bf16.msra.mxu1 %v304_v2  ;;  %v302_v5 = vld [vmem:[#allocation4 + $0x28] sm:$0xff]  ;;  %v293_v6 = vld [vmem:[#allocation2 + $0x20] sm:$0xff]  ;;  %v292_v8 = vld [vmem:[#allocation2 + $0x18] sm:$0xff] }
   0xe   :  { %v301_v7 = vld [vmem:[#allocation4 + $0x20] sm:$0xff]  ;;  %v300_v9 = vld [vmem:[#allocation4 + $0x18] sm:$0xff]  ;;  %v291_v10 = vld [vmem:[#allocation2 + $0x10] sm:$0xff] }
   0xf   :  { %v299_v11 = vld [vmem:[#allocation4 + $0x10] sm:$0xff]  ;;  %v290_v12 = vld [vmem:[#allocation2 + $0x8] sm:$0xff]  ;;  %v289_v13 = vld [vmem:[#allocation2] sm:$0xff] }
  0x10   :  { %123 = vmatpush.bf16.msra.mxu0 %v295_v1  ;;  %v52_v14 = vld [vmem:[%s415_s0] sm:$0xff]  ;;  %v298_v16 = vld [vmem:[#allocation4 + $0x8] sm:$0xff] }
  0x11   :  { %206 = vmatpush.bf16.msra.mxu1 %v303_v3  ;;  %v53_v15 = vpack.c.bf16 %v52_v14, %v52_v14  ;;  %v297_v17 = vld [vmem:[#allocation4] sm:$0xff] }
  0x12   :  { %v309_v18 = vld [vmem:[%s417_s2] ss:$0 sm:$0xff] }
  0x13   :  { %v310_v24 = vld [vmem:[%s419_s4] ss:$0 sm:$0xff] }
  0x14   :  { %124 = vmatpush.bf16.msra.mxu0 %v294_v4 }
  0x15   :  { %207 = vmatpush.bf16.msra.mxu1 %v302_v5 }
  0x18   :  { %125 = vmatpush.bf16.msra.mxu0 %v293_v6 }
  0x19   :  { %208 = vmatpush.bf16.msra.mxu1 %v301_v7 }
  0x1c   :  { %126 = vmatpush.bf16.msra.mxu0 %v292_v8 }
  0x1d   :  { %209 = vmatpush.bf16.msra.mxu1 %v300_v9 }
  0x20   :  { %127 = vmatpush.bf16.msra.mxu0 %v291_v10 }
  0x21   :  { %210 = vmatpush.bf16.msra.mxu1 %v299_v11 }
  0x24   :  { %128 = vmatpush.bf16.msra.mxu0 %v290_v12 }
  0x25   :  { %211 = vmatpush.bf16.msra.mxu1 %v298_v16 }
  0x28   :  { %129 = vmatpush.bf16.msra.mxu0 %v289_v13 }
  0x29   :  { %212 = vmatpush.bf16.msra.mxu1 %v297_v17 }
  0x2b   :  { %130 = vmatmul.bf16.vlgmr.msra.gmra.mxu0 %v53_v15 }
  0xa8   :  { %v131_v19 = vpop.f32.mrf.mxu0 }
  0xa9   :  { %v132_v20 = vadd.f32 %v309_v18, %v131_v19 }
  0xab   :  { %v135_v21 = vmax.f32 %v132_v20, 0.0 }
  0xad   :  { %v136_v22 = vpack.c.bf16 %v135_v21, %v135_v21 }
  0xaf   :  { %213 = vmatmul.bf16.vlgmr.msra.gmra.mxu1 %v136_v22 }
  0xb0   :  { %v133_v23 = vpop.f32.mrf.mxu0 }
 0x12c   :  { %v214_v25 = vpop.f32.mrf.mxu1 }
 0x12d   :  { %v215_v26 = vadd.f32 %v310_v24, %v214_v25 }
 0x12f   :  { %218 = vst [vmem:[%s420_s5] sm:$0xff] %v215_v26 }
 0x134   :  { %v216_v27 = vpop.f32.mrf.mxu1 }
 0x135   :  { %223 = vsyncpa [#allocation3], 1 }
 0x136   :  { %224 = vsyncpa [#allocation5], 1 }

</bundles_post_ra>
